<compile_context>
chip_gen: v5e
topology: v5e:2x2
jax: 0.10.0
libtpu: 0.0.40
codegen_flags: <defaults>
</compile_context>

<pallas_src>
import functools

import jax
import jax.numpy as jnp
from jax.experimental import pallas as pl
from jax.experimental.pallas import tpu as pltpu


def _round_up(v, m):
    return ((v + m - 1) // m) * m


# --------------------------------------------------------------------------- #
# Kernel: per subject-block.  Everything detector-side is precomputed.
# --------------------------------------------------------------------------- #
def _mditre_kernel(x_ref, w_ref, det_ref, dense_ref, out_ref, *,
                   num_rules_padded, num_centers, k_thresh):
    Rp, C = num_rules_padded, num_centers
    f32 = jnp.float32

    # ---- fused spatial+time aggregation: one MXU matmul, K = T*J ----------
    #   acc[n, s] = sum_{t,j} tw_norm[n,t] * otu_wts[n,j] * x[t,j,s]
    acc = jnp.dot(w_ref[...], x_ref[...],
                  preferred_element_type=f32)          # (N_pad, S_blk), f32

    thresh = det_ref[:, 0:1]                           # (N_pad, 1)
    z_alpha = det_ref[:, 1:2]                          # (N_pad, 1)

    # ---- Threshold + Rules (soft AND over the C centers) -------------------
    # Processed per center chunk (Rp rows) to bound vreg pressure.
    rule = None
    for c in range(C):                                 # static unroll, small C
        lo = c * Rp
        seg = acc[lo:lo + Rp, :]                       # (Rp, S_blk)
        x_thr = jax.nn.sigmoid((seg - thresh[lo:lo + Rp, :]) * k_thresh)
        one_minus = 1.0 - z_alpha[lo:lo + Rp, :] * (1.0 - x_thr)
        rule = one_minus if rule is None else rule * one_minus

    # ---- DenseLayerAbun: M=1 -> VPU multiply + sublane (XLU) reduction ------
    w_eff = dense_ref[:, 0:1]                          # (Rp, 1), padded rows = 0
    bias = dense_ref[0:1, 1:2]                         # (1, 1)
    out_ref[...] = jnp.sum(w_eff * rule, axis=0, keepdims=True) + bias


# --------------------------------------------------------------------------- #
# One-time layout of the activation stream (cache this outside the hot loop).
# --------------------------------------------------------------------------- #
def prepare_x(x, *, s_block=512, mm_dtype=jnp.float32):
    """x: (S, J, T)  ->  x2: (T*J, S_pad) subject-minor, plus chosen S_blk."""
    S, J, T = x.shape
    S_blk = max(128, min(_round_up(s_block, 128), _round_up(S, 128)))
    # Prefer >=2 subject blocks (v7x has 2 TensorCores) when the halves stay
    # roofline-friendly (>=256 lanes).
    if S_blk >= 512 and _round_up(S, S_blk) == S_blk:
        S_blk = _round_up(S_blk // 2, 128)
    S_pad = _round_up(S, S_blk)
    x2 = jnp.transpose(x, (2, 1, 0)).reshape(T * J, S).astype(mm_dtype)
    x2 = jnp.pad(x2, ((0, 0), (0, S_pad - S)))
    return x2, S_blk


# --------------------------------------------------------------------------- #
# Grid-invariant detector math (tiny, pure JAX) -> small VMEM inputs.
# --------------------------------------------------------------------------- #
def precompute_detector_params(params, dist, num_time, *, k_otu, k_time,
                               k_alpha, k_beta, mm_dtype):
    f32 = jnp.float32
    R, C, D = params["eta"].shape
    J = dist.shape[0]
    T = num_time
    R_pad = max(8, _round_up(R, 8))
    N_pad = C * R_pad

    # SpatialAggDynamic: otu weights per detector
    eta = jnp.asarray(params["eta"], f32)                              # (R,C,D)
    kappa = jnp.exp(jnp.asarray(params["kappa"], f32))[..., None]      # (R,C,1)
    d = jnp.asarray(dist, f32)                                         # (J,D)
    emb_dist = jnp.sqrt(
        jnp.sum((eta[:, :, None, :] - d[None, None, :, :]) ** 2, axis=-1))
    otu_wts = jax.nn.sigmoid((kappa - emb_dist) * k_otu)               # (R,C,J)

    # TimeAggAbun: normalized unit-boxcar time weights
    a = jax.nn.sigmoid(jnp.asarray(params["abun_a"], f32))[..., None]  # (R,C,1)
    b = jax.nn.sigmoid(jnp.asarray(params["abun_b"], f32))[..., None]
    sigma = T * a
    mu = T * a / 2.0 + (1.0 - a) * T * b
    times = jnp.arange(T, dtype=f32)
    dt = times - mu                                                    # (R,C,T)
    tw = (jax.nn.sigmoid((dt + sigma / 2.0) * k_time)
          - jax.nn.sigmoid((dt - sigma / 2.0) * k_time))
    tw_norm = tw / (jnp.sum(tw, axis=-1, keepdims=True) + 1e-8)        # (R,C,T)

    # Fused weight: W[n, t*J + j] = tw_norm[n, t] * otu_wts[n, j]
    # detectors laid out center-major: n = c * R_pad + r   (padded rows = 0)
    W = tw_norm[:, :, :, None] * otu_wts[:, :, None, :]                # (R,C,T,J)
    W = jnp.transpose(W, (1, 0, 2, 3))                                 # (C,R,T,J)
    W = jnp.pad(W, ((0, 0), (0, R_pad - R), (0, 0), (0, 0)))
    W = W.reshape(N_pad, T * J).astype(mm_dtype)

    def pack_rc(p):                                   # (R,C) -> (N_pad,)
        p = jnp.asarray(p, f32).T                                      # (C,R)
        p = jnp.pad(p, ((0, 0), (0, R_pad - R)))
        return p.reshape(N_pad)

    thresh = pack_rc(params["thresh"])
    # padded detectors get z_alpha = 0 -> rule factor 1 (inert)
    z_alpha = pack_rc(jax.nn.sigmoid(jnp.asarray(params["alpha"], f32) * k_alpha))
    det = jnp.stack([thresh, z_alpha], axis=1)                         # (N_pad, 2)

    # DenseLayerAbun: effective weight = weight * sigmoid(beta * k_beta)
    w = jnp.asarray(params["weight"], f32).reshape(R)
    beta = jnp.asarray(params["beta"], f32).reshape(R)
    bias = jnp.asarray(params["bias"], f32).reshape(())
    w_eff = w * jax.nn.sigmoid(beta * k_beta)
    dense = jnp.zeros((R_pad, 2), f32)                # zero pad -> padded rules inert
    dense = dense.at[:R, 0].set(w_eff)
    dense = dense.at[0, 1].set(bias)
    return W, det, dense, R_pad, N_pad


# --------------------------------------------------------------------------- #
# Forward wrapper.
# --------------------------------------------------------------------------- #
def mditre_abun_forward(x, params, dist, *, k_otu=1.0, k_time=1.0,
                        k_thresh=1.0, k_alpha=1.0, k_beta=1.0,
                        s_block=512, use_bf16_matmul=True):
    """Eval-mode MDITREAbun forward. x: (S, J, T); returns (S,)."""
    S, J, T = x.shape
    R, C, D = params["eta"].shape
    assert dist.shape == (J, D)
    mm_dtype = jnp.bfloat16 if use_bf16_matmul else jnp.float32

    # NOTE: prepare_x re-lays x out (one HBM pass); in a real pipeline produce
    # / cache x in this (T*J, S_pad) layout once outside the hot path.
    x2, S_blk = prepare_x(x, s_block=s_block, mm_dtype=mm_dtype)
    TJ, S_pad = x2.shape
    num_blocks = S_pad // S_blk

    W, det, dense, R_pad, N_pad = precompute_detector_params(
        params, dist, T, k_otu=k_otu, k_time=k_time, k_alpha=k_alpha,
        k_beta=k_beta, mm_dtype=mm_dtype)

    kernel = functools.partial(
        _mditre_kernel, num_rules_padded=R_pad, num_centers=C,
        k_thresh=k_thresh)

    # Raise the scoped VMEM limit only when the double-buffered tiles need it;
    # cap at 56 MiB so it also fits v7x's 64 MiB physical VMEM.
    itemsize = jnp.dtype(mm_dtype).itemsize
    need = (2 * TJ * S_blk * itemsize          # double-buffered x tile
            + 2 * N_pad * TJ * itemsize        # W (resident, double-buffered)
            + 2 * N_pad * S_blk * 4            # matmul accumulator headroom
            + (2 << 20))
    vmem_limit = int(min(need + (8 << 20), 56 << 20)) if need > (32 << 20) else None

    out = pl.pallas_call(
        kernel,
        out_shape=jax.ShapeDtypeStruct((1, S_pad), jnp.float32),
        grid=(num_blocks,),
        in_specs=[
            pl.BlockSpec((TJ, S_blk), lambda i: (0, i)),     # x tile: only big DMA
            pl.BlockSpec((N_pad, TJ), lambda i: (0, 0)),     # fused spatial+time W
            pl.BlockSpec((N_pad, 2), lambda i: (0, 0)),      # thresh / z_alpha
            pl.BlockSpec((R_pad, 2), lambda i: (0, 0)),      # dense weights / bias
        ],
        out_specs=pl.BlockSpec((1, S_blk), lambda i: (0, i)),
        compiler_params=pltpu.CompilerParams(
            dimension_semantics=("parallel",),
            vmem_limit_bytes=vmem_limit),
    )(x2, W, det, dense)
    return out[0, :S]


# --------------------------------------------------------------------------- #
# Pure-JAX mirror of the PyTorch forward (eval / no-noise path).
# --------------------------------------------------------------------------- #
def reference_forward(x, params, dist, *, k_otu=1.0, k_time=1.0,
                      k_thresh=1.0, k_alpha=1.0, k_beta=1.0):
    S, J, T = x.shape
    kappa = jnp.exp(params["kappa"])[..., None]                       # (R,C,1)
    emb_dist = jnp.linalg.norm(
        params["eta"][:, :, None, :] - dist[None, None, :, :], axis=-1)  # (R,C,J)
    wts = jax.nn.sigmoid((kappa - emb_dist) * k_otu)
    xa = jnp.einsum("kij,sjt->skit", wts, x)                          # (S,R,C,T)
    a = jax.nn.sigmoid(params["abun_a"])[..., None]
    b = jax.nn.sigmoid(params["abun_b"])[..., None]
    sigma = T * a
    mu = T * a / 2.0 + (1 - a) * T * b
    times = jnp.arange(T, dtype=jnp.float32)
    dt = times - mu
    tw = (jax.nn.sigmoid((dt + sigma / 2) * k_time)
          - jax.nn.sigmoid((dt - sigma / 2) * k_time))
    twn = tw / (tw.sum(-1, keepdims=True) + 1e-8)
    x_abun = (xa * twn).sum(-1)                                       # (S,R,C)
    x_thr = jax.nn.sigmoid((x_abun - params["thresh"]) * k_thresh)
    z_a = jax.nn.sigmoid(params["alpha"] * k_alpha)
    rules = jnp.prod(1.0 - z_a * (1.0 - x_thr), axis=-1)              # (S,R)
    z_b = jax.nn.sigmoid(params["beta"] * k_beta)
    w = params["weight"] * z_b[None, :]                               # (1,R)
    out = rules @ w.T + params["bias"]                                # (S,1)
    return out.squeeze(-1)


if __name__ == "__main__":
    # small, forward-consistent shapes
    S, R, C, J, T, D = 2, 4, 8, 16, 8, 4  # subjects, rules, otu centers, otus, time, emb dim

    key = jax.random.PRNGKey(0)
    ks = jax.random.split(key, 11)
    x = jax.random.uniform(ks[0], (S, J, T), jnp.float32)             # abundances
    dist = jax.random.uniform(ks[1], (J, D), jnp.float32)             # phylo embedding
    params = {
        "eta":    0.5 * jax.random.normal(ks[2], (R, C, D), jnp.float32),
        "kappa":  0.3 * jax.random.normal(ks[3], (R, C), jnp.float32),   # log-kappa
        "abun_a": 0.5 * jax.random.normal(ks[4], (R, C), jnp.float32),
        "abun_b": 0.5 * jax.random.normal(ks[5], (R, C), jnp.float32),
        "thresh": 0.1 * jax.random.normal(ks[6], (R, C), jnp.float32),
        "alpha":  0.5 * jax.random.normal(ks[7], (R, C), jnp.float32),
        "weight": 0.5 * jax.random.normal(ks[8], (1, R), jnp.float32),
        "bias":   0.1 * jax.random.normal(ks[9], (1,), jnp.float32),
        "beta":   0.5 * jax.random.normal(ks[10], (R,), jnp.float32),
    }

    ref = reference_forward(x, params, dist)

    # f32 path: tight tolerance vs the reference
    out_f32 = jax.block_until_ready(
        mditre_abun_forward(x, params, dist, use_bf16_matmul=False))
    assert out_f32.shape == (S,)
    assert jnp.allclose(out_f32, ref, rtol=1e-4, atol=1e-4), (out_f32, ref)

    # default bf16 matmul path: looser tolerance (bf16 inputs, f32 accumulation)
    out_bf16 = jax.block_until_ready(
        mditre_abun_forward(x, params, dist, use_bf16_matmul=True))
    assert out_bf16.shape == (S,)
    assert jnp.allclose(out_bf16, ref, rtol=3e-2, atol=3e-2), (out_bf16, ref)

    print("KERNEL_OK")
</pallas_src>

<mosaic_0001>
module attributes {stable_mosaic.version = 11 : i64} {
  func.func @_mditre_kernel(%arg0: i32, %arg1: memref<128x128xf32, #tpu.memory_space<vmem>>, %arg2: memref<64x128xf32, #tpu.memory_space<vmem>>, %arg3: memref<64x2xf32, #tpu.memory_space<vmem>>, %arg4: memref<8x2xf32, #tpu.memory_space<vmem>>, %arg5: memref<1x128xf32, #tpu.memory_space<vmem>>) attributes {dimension_semantics = [#tpu.dimension_semantics<parallel>], iteration_bounds = array<i64: 1>, scalar_prefetch = 0 : i64, scratch_operands = 0 : i64, tpu.core_type = #tpu.core_type<tc>, window_params = [{transform_indices = @transform_0, window_bounds = array<i64: 128, 128>}, {pipeline_mode = #tpu.pipeline_mode<synchronous>, transform_indices = @transform_1, window_bounds = array<i64: 64, 128>}, {pipeline_mode = #tpu.pipeline_mode<synchronous>, transform_indices = @transform_2, window_bounds = array<i64: 64, 2>}, {pipeline_mode = #tpu.pipeline_mode<synchronous>, transform_indices = @transform_3, window_bounds = array<i64: 8, 2>}, {transform_indices = @transform_4, window_bounds = array<i64: 1, 128>}]} {
    %c0 = arith.constant 0 : index
    %c0_0 = arith.constant 0 : index
    %0 = vector.load %arg2[%c0, %c0_0] : memref<64x128xf32, #tpu.memory_space<vmem>>, vector<64x128xf32>
    %c0_1 = arith.constant 0 : index
    %c0_2 = arith.constant 0 : index
    %1 = vector.load %arg1[%c0_1, %c0_2] : memref<128x128xf32, #tpu.memory_space<vmem>>, vector<128x128xf32>
    %cst = arith.constant dense<0.000000e+00> : vector<64x128xf32>
    %2 = tpu.matmul %0, %1, %cst {dimension_numbers = #tpu.dot_dimension_numbers<[1], [0], [0], [1], [0, 0, 1, 1], [], []>} : vector<64x128xf32>, vector<128x128xf32>, vector<64x128xf32> -> vector<64x128xf32>
    %c0_3 = arith.constant 0 : index
    %c0_4 = arith.constant 0 : index
    %3 = vector.load %arg3[%c0_3, %c0_4] : memref<64x2xf32, #tpu.memory_space<vmem>>, vector<64x1xf32>
    %c0_5 = arith.constant 0 : index
    %c1 = arith.constant 1 : index
    %4 = vector.load %arg3[%c0_5, %c1] : memref<64x2xf32, #tpu.memory_space<vmem>>, vector<64x1xf32>
    %5 = vector.extract_strided_slice %2 {offsets = [0, 0], sizes = [8, 128], strides = [1, 1]} : vector<64x128xf32> to vector<8x128xf32>
    %6 = vector.extract_strided_slice %3 {offsets = [0, 0], sizes = [8, 1], strides = [1, 1]} : vector<64x1xf32> to vector<8x1xf32>
    %7 = vector.broadcast %6 : vector<8x1xf32> to vector<8x128xf32>
    %8 = arith.subf %5, %7 : vector<8x128xf32>
    %cst_6 = arith.constant 1.000000e+00 : f32
    %9 = vector.broadcast %cst_6 : f32 to vector<8x128xf32>
    %10 = arith.mulf %8, %9 : vector<8x128xf32>
    %11 = arith.negf %10 : vector<8x128xf32>
    %12 = math.exp %11 : vector<8x128xf32>
    %cst_7 = arith.constant 1.000000e+00 : f32
    %13 = vector.broadcast %cst_7 : f32 to vector<8x128xf32>
    %14 = arith.addf %13, %12 : vector<8x128xf32>
    %15 = arith.divf %13, %14 : vector<8x128xf32>
    %16 = vector.extract_strided_slice %4 {offsets = [0, 0], sizes = [8, 1], strides = [1, 1]} : vector<64x1xf32> to vector<8x1xf32>
    %cst_8 = arith.constant 1.000000e+00 : f32
    %17 = vector.broadcast %cst_8 : f32 to vector<8x128xf32>
    %18 = arith.subf %17, %15 : vector<8x128xf32>
    %19 = vector.broadcast %16 : vector<8x1xf32> to vector<8x128xf32>
    %20 = arith.mulf %19, %18 : vector<8x128xf32>
    %cst_9 = arith.constant 1.000000e+00 : f32
    %21 = vector.broadcast %cst_9 : f32 to vector<8x128xf32>
    %22 = arith.subf %21, %20 : vector<8x128xf32>
    %23 = vector.extract_strided_slice %2 {offsets = [8, 0], sizes = [8, 128], strides = [1, 1]} : vector<64x128xf32> to vector<8x128xf32>
    %24 = vector.extract_strided_slice %3 {offsets = [8, 0], sizes = [8, 1], strides = [1, 1]} : vector<64x1xf32> to vector<8x1xf32>
    %25 = vector.broadcast %24 : vector<8x1xf32> to vector<8x128xf32>
    %26 = arith.subf %23, %25 : vector<8x128xf32>
    %cst_10 = arith.constant 1.000000e+00 : f32
    %27 = vector.broadcast %cst_10 : f32 to vector<8x128xf32>
    %28 = arith.mulf %26, %27 : vector<8x128xf32>
    %29 = arith.negf %28 : vector<8x128xf32>
    %30 = math.exp %29 : vector<8x128xf32>
    %cst_11 = arith.constant 1.000000e+00 : f32
    %31 = vector.broadcast %cst_11 : f32 to vector<8x128xf32>
    %32 = arith.addf %31, %30 : vector<8x128xf32>
    %33 = arith.divf %31, %32 : vector<8x128xf32>
    %34 = vector.extract_strided_slice %4 {offsets = [8, 0], sizes = [8, 1], strides = [1, 1]} : vector<64x1xf32> to vector<8x1xf32>
    %cst_12 = arith.constant 1.000000e+00 : f32
    %35 = vector.broadcast %cst_12 : f32 to vector<8x128xf32>
    %36 = arith.subf %35, %33 : vector<8x128xf32>
    %37 = vector.broadcast %34 : vector<8x1xf32> to vector<8x128xf32>
    %38 = arith.mulf %37, %36 : vector<8x128xf32>
    %cst_13 = arith.constant 1.000000e+00 : f32
    %39 = vector.broadcast %cst_13 : f32 to vector<8x128xf32>
    %40 = arith.subf %39, %38 : vector<8x128xf32>
    %41 = arith.mulf %22, %40 : vector<8x128xf32>
    %42 = vector.extract_strided_slice %2 {offsets = [16, 0], sizes = [8, 128], strides = [1, 1]} : vector<64x128xf32> to vector<8x128xf32>
    %43 = vector.extract_strided_slice %3 {offsets = [16, 0], sizes = [8, 1], strides = [1, 1]} : vector<64x1xf32> to vector<8x1xf32>
    %44 = vector.broadcast %43 : vector<8x1xf32> to vector<8x128xf32>
    %45 = arith.subf %42, %44 : vector<8x128xf32>
    %cst_14 = arith.constant 1.000000e+00 : f32
    %46 = vector.broadcast %cst_14 : f32 to vector<8x128xf32>
    %47 = arith.mulf %45, %46 : vector<8x128xf32>
    %48 = arith.negf %47 : vector<8x128xf32>
    %49 = math.exp %48 : vector<8x128xf32>
    %cst_15 = arith.constant 1.000000e+00 : f32
    %50 = vector.broadcast %cst_15 : f32 to vector<8x128xf32>
    %51 = arith.addf %50, %49 : vector<8x128xf32>
    %52 = arith.divf %50, %51 : vector<8x128xf32>
    %53 = vector.extract_strided_slice %4 {offsets = [16, 0], sizes = [8, 1], strides = [1, 1]} : vector<64x1xf32> to vector<8x1xf32>
    %cst_16 = arith.constant 1.000000e+00 : f32
    %54 = vector.broadcast %cst_16 : f32 to vector<8x128xf32>
    %55 = arith.subf %54, %52 : vector<8x128xf32>
    %56 = vector.broadcast %53 : vector<8x1xf32> to vector<8x128xf32>
    %57 = arith.mulf %56, %55 : vector<8x128xf32>
    %cst_17 = arith.constant 1.000000e+00 : f32
    %58 = vector.broadcast %cst_17 : f32 to vector<8x128xf32>
    %59 = arith.subf %58, %57 : vector<8x128xf32>
    %60 = arith.mulf %41, %59 : vector<8x128xf32>
    %61 = vector.extract_strided_slice %2 {offsets = [24, 0], sizes = [8, 128], strides = [1, 1]} : vector<64x128xf32> to vector<8x128xf32>
    %62 = vector.extract_strided_slice %3 {offsets = [24, 0], sizes = [8, 1], strides = [1, 1]} : vector<64x1xf32> to vector<8x1xf32>
    %63 = vector.broadcast %62 : vector<8x1xf32> to vector<8x128xf32>
    %64 = arith.subf %61, %63 : vector<8x128xf32>
    %cst_18 = arith.constant 1.000000e+00 : f32
    %65 = vector.broadcast %cst_18 : f32 to vector<8x128xf32>
    %66 = arith.mulf %64, %65 : vector<8x128xf32>
    %67 = arith.negf %66 : vector<8x128xf32>
    %68 = math.exp %67 : vector<8x128xf32>
    %cst_19 = arith.constant 1.000000e+00 : f32
    %69 = vector.broadcast %cst_19 : f32 to vector<8x128xf32>
    %70 = arith.addf %69, %68 : vector<8x128xf32>
    %71 = arith.divf %69, %70 : vector<8x128xf32>
    %72 = vector.extract_strided_slice %4 {offsets = [24, 0], sizes = [8, 1], strides = [1, 1]} : vector<64x1xf32> to vector<8x1xf32>
    %cst_20 = arith.constant 1.000000e+00 : f32
    %73 = vector.broadcast %cst_20 : f32 to vector<8x128xf32>
    %74 = arith.subf %73, %71 : vector<8x128xf32>
    %75 = vector.broadcast %72 : vector<8x1xf32> to vector<8x128xf32>
    %76 = arith.mulf %75, %74 : vector<8x128xf32>
    %cst_21 = arith.constant 1.000000e+00 : f32
    %77 = vector.broadcast %cst_21 : f32 to vector<8x128xf32>
    %78 = arith.subf %77, %76 : vector<8x128xf32>
    %79 = arith.mulf %60, %78 : vector<8x128xf32>
    %80 = vector.extract_strided_slice %2 {offsets = [32, 0], sizes = [8, 128], strides = [1, 1]} : vector<64x128xf32> to vector<8x128xf32>
    %81 = vector.extract_strided_slice %3 {offsets = [32, 0], sizes = [8, 1], strides = [1, 1]} : vector<64x1xf32> to vector<8x1xf32>
    %82 = vector.broadcast %81 : vector<8x1xf32> to vector<8x128xf32>
    %83 = arith.subf %80, %82 : vector<8x128xf32>
    %cst_22 = arith.constant 1.000000e+00 : f32
    %84 = vector.broadcast %cst_22 : f32 to vector<8x128xf32>
    %85 = arith.mulf %83, %84 : vector<8x128xf32>
    %86 = arith.negf %85 : vector<8x128xf32>
    %87 = math.exp %86 : vector<8x128xf32>
    %cst_23 = arith.constant 1.000000e+00 : f32
    %88 = vector.broadcast %cst_23 : f32 to vector<8x128xf32>
    %89 = arith.addf %88, %87 : vector<8x128xf32>
    %90 = arith.divf %88, %89 : vector<8x128xf32>
    %91 = vector.extract_strided_slice %4 {offsets = [32, 0], sizes = [8, 1], strides = [1, 1]} : vector<64x1xf32> to vector<8x1xf32>
    %cst_24 = arith.constant 1.000000e+00 : f32
    %92 = vector.broadcast %cst_24 : f32 to vector<8x128xf32>
    %93 = arith.subf %92, %90 : vector<8x128xf32>
    %94 = vector.broadcast %91 : vector<8x1xf32> to vector<8x128xf32>
    %95 = arith.mulf %94, %93 : vector<8x128xf32>
    %cst_25 = arith.constant 1.000000e+00 : f32
    %96 = vector.broadcast %cst_25 : f32 to vector<8x128xf32>
    %97 = arith.subf %96, %95 : vector<8x128xf32>
    %98 = arith.mulf %79, %97 : vector<8x128xf32>
    %99 = vector.extract_strided_slice %2 {offsets = [40, 0], sizes = [8, 128], strides = [1, 1]} : vector<64x128xf32> to vector<8x128xf32>
    %100 = vector.extract_strided_slice %3 {offsets = [40, 0], sizes = [8, 1], strides = [1, 1]} : vector<64x1xf32> to vector<8x1xf32>
    %101 = vector.broadcast %100 : vector<8x1xf32> to vector<8x128xf32>
    %102 = arith.subf %99, %101 : vector<8x128xf32>
    %cst_26 = arith.constant 1.000000e+00 : f32
    %103 = vector.broadcast %cst_26 : f32 to vector<8x128xf32>
    %104 = arith.mulf %102, %103 : vector<8x128xf32>
    %105 = arith.negf %104 : vector<8x128xf32>
    %106 = math.exp %105 : vector<8x128xf32>
    %cst_27 = arith.constant 1.000000e+00 : f32
    %107 = vector.broadcast %cst_27 : f32 to vector<8x128xf32>
    %108 = arith.addf %107, %106 : vector<8x128xf32>
    %109 = arith.divf %107, %108 : vector<8x128xf32>
    %110 = vector.extract_strided_slice %4 {offsets = [40, 0], sizes = [8, 1], strides = [1, 1]} : vector<64x1xf32> to vector<8x1xf32>
    %cst_28 = arith.constant 1.000000e+00 : f32
    %111 = vector.broadcast %cst_28 : f32 to vector<8x128xf32>
    %112 = arith.subf %111, %109 : vector<8x128xf32>
    %113 = vector.broadcast %110 : vector<8x1xf32> to vector<8x128xf32>
    %114 = arith.mulf %113, %112 : vector<8x128xf32>
    %cst_29 = arith.constant 1.000000e+00 : f32
    %115 = vector.broadcast %cst_29 : f32 to vector<8x128xf32>
    %116 = arith.subf %115, %114 : vector<8x128xf32>
    %117 = arith.mulf %98, %116 : vector<8x128xf32>
    %118 = vector.extract_strided_slice %2 {offsets = [48, 0], sizes = [8, 128], strides = [1, 1]} : vector<64x128xf32> to vector<8x128xf32>
    %119 = vector.extract_strided_slice %3 {offsets = [48, 0], sizes = [8, 1], strides = [1, 1]} : vector<64x1xf32> to vector<8x1xf32>
    %120 = vector.broadcast %119 : vector<8x1xf32> to vector<8x128xf32>
    %121 = arith.subf %118, %120 : vector<8x128xf32>
    %cst_30 = arith.constant 1.000000e+00 : f32
    %122 = vector.broadcast %cst_30 : f32 to vector<8x128xf32>
    %123 = arith.mulf %121, %122 : vector<8x128xf32>
    %124 = arith.negf %123 : vector<8x128xf32>
    %125 = math.exp %124 : vector<8x128xf32>
    %cst_31 = arith.constant 1.000000e+00 : f32
    %126 = vector.broadcast %cst_31 : f32 to vector<8x128xf32>
    %127 = arith.addf %126, %125 : vector<8x128xf32>
    %128 = arith.divf %126, %127 : vector<8x128xf32>
    %129 = vector.extract_strided_slice %4 {offsets = [48, 0], sizes = [8, 1], strides = [1, 1]} : vector<64x1xf32> to vector<8x1xf32>
    %cst_32 = arith.constant 1.000000e+00 : f32
    %130 = vector.broadcast %cst_32 : f32 to vector<8x128xf32>
    %131 = arith.subf %130, %128 : vector<8x128xf32>
    %132 = vector.broadcast %129 : vector<8x1xf32> to vector<8x128xf32>
    %133 = arith.mulf %132, %131 : vector<8x128xf32>
    %cst_33 = arith.constant 1.000000e+00 : f32
    %134 = vector.broadcast %cst_33 : f32 to vector<8x128xf32>
    %135 = arith.subf %134, %133 : vector<8x128xf32>
    %136 = arith.mulf %117, %135 : vector<8x128xf32>
    %137 = vector.extract_strided_slice %2 {offsets = [56, 0], sizes = [8, 128], strides = [1, 1]} : vector<64x128xf32> to vector<8x128xf32>
    %138 = vector.extract_strided_slice %3 {offsets = [56, 0], sizes = [8, 1], strides = [1, 1]} : vector<64x1xf32> to vector<8x1xf32>
    %139 = vector.broadcast %138 : vector<8x1xf32> to vector<8x128xf32>
    %140 = arith.subf %137, %139 : vector<8x128xf32>
    %cst_34 = arith.constant 1.000000e+00 : f32
    %141 = vector.broadcast %cst_34 : f32 to vector<8x128xf32>
    %142 = arith.mulf %140, %141 : vector<8x128xf32>
    %143 = arith.negf %142 : vector<8x128xf32>
    %144 = math.exp %143 : vector<8x128xf32>
    %cst_35 = arith.constant 1.000000e+00 : f32
    %145 = vector.broadcast %cst_35 : f32 to vector<8x128xf32>
    %146 = arith.addf %145, %144 : vector<8x128xf32>
    %147 = arith.divf %145, %146 : vector<8x128xf32>
    %148 = vector.extract_strided_slice %4 {offsets = [56, 0], sizes = [8, 1], strides = [1, 1]} : vector<64x1xf32> to vector<8x1xf32>
    %cst_36 = arith.constant 1.000000e+00 : f32
    %149 = vector.broadcast %cst_36 : f32 to vector<8x128xf32>
    %150 = arith.subf %149, %147 : vector<8x128xf32>
    %151 = vector.broadcast %148 : vector<8x1xf32> to vector<8x128xf32>
    %152 = arith.mulf %151, %150 : vector<8x128xf32>
    %cst_37 = arith.constant 1.000000e+00 : f32
    %153 = vector.broadcast %cst_37 : f32 to vector<8x128xf32>
    %154 = arith.subf %153, %152 : vector<8x128xf32>
    %155 = arith.mulf %136, %154 : vector<8x128xf32>
    %c0_38 = arith.constant 0 : index
    %c0_39 = arith.constant 0 : index
    %156 = vector.load %arg4[%c0_38, %c0_39] : memref<8x2xf32, #tpu.memory_space<vmem>>, vector<8x1xf32>
    %c0_40 = arith.constant 0 : index
    %c1_41 = arith.constant 1 : index
    %157 = vector.load %arg4[%c0_40, %c1_41] : memref<8x2xf32, #tpu.memory_space<vmem>>, vector<1x1xf32>
    %158 = vector.broadcast %156 : vector<8x1xf32> to vector<8x128xf32>
    %159 = arith.mulf %158, %155 : vector<8x128xf32>
    %cst_42 = arith.constant dense<0.000000e+00> : vector<128xf32>
    %160 = vector.multi_reduction <add>, %159, %cst_42 [0] : vector<8x128xf32> to vector<128xf32>
    %161 = vector.shape_cast %160 : vector<128xf32> to vector<1x128xf32>
    %162 = vector.broadcast %157 : vector<1x1xf32> to vector<1x128xf32>
    %163 = arith.addf %161, %162 : vector<1x128xf32>
    %c0_43 = arith.constant 0 : index
    %c0_44 = arith.constant 0 : index
    %164 = vector.load %arg5[%c0_43, %c0_44] : memref<1x128xf32, #tpu.memory_space<vmem>>, vector<1x128xf32>
    tpu.vector_store %arg5[%c0_43, %c0_44], %163 {strides = array<i32>} : memref<1x128xf32, #tpu.memory_space<vmem>>, vector<1x128xf32>,
    return
  }
  func.func @transform_0(%arg0: i32) -> (i32, i32) {
    %c0_i32 = arith.constant 0 : i32
    %c0_i32_0 = arith.constant 0 : i32
    return %c0_i32, %arg0 : i32, i32
  }
  func.func @transform_1(%arg0: i32) -> (i32, i32) {
    %c0_i32 = arith.constant 0 : i32
    %c0_i32_0 = arith.constant 0 : i32
    %c0_i32_1 = arith.constant 0 : i32
    return %c0_i32, %c0_i32_0 : i32, i32
  }
  func.func @transform_2(%arg0: i32) -> (i32, i32) {
    %c0_i32 = arith.constant 0 : i32
    %c0_i32_0 = arith.constant 0 : i32
    %c0_i32_1 = arith.constant 0 : i32
    return %c0_i32, %c0_i32_0 : i32, i32
  }
  func.func @transform_3(%arg0: i32) -> (i32, i32) {
    %c0_i32 = arith.constant 0 : i32
    %c0_i32_0 = arith.constant 0 : i32
    %c0_i32_1 = arith.constant 0 : i32
    return %c0_i32, %c0_i32_0 : i32, i32
  }
  func.func @transform_4(%arg0: i32) -> (i32, i32) {
    %c0_i32 = arith.constant 0 : i32
    %c0_i32_0 = arith.constant 0 : i32
    return %c0_i32, %arg0 : i32, i32
  }
}

</mosaic_0001>

<bundles_post_ra>
// kernel: tpu_custom_call.1
= control target key start
LH: loop header
LB: loop body
LE: loop exit
PB: predicated region body
PF: predicated region fallthrough
CT: control target
= control target key end

     0   :  { %9 = vsyncpa [#allocation3], 0  ;;  %s781_s0 = inlined_call_operand.hbm [shape: f32[128,128], index: 0, kind: input, shape index: {}]   ;;  %s782_s1 = inlined_call_operand.vmem [shape: f32[64,128], index: 1, kind: input, shape index: {}]   ;;  %s783_s2 = inlined_call_operand.vmem [shape: f32[64,2], index: 2, kind: input, shape index: {}]   ;;  %s784_s3 = inlined_call_operand.vmem [shape: f32[8,2], index: 3, kind: input, shape index: {}]   ;;  %s785_s4 = inlined_call_operand.hbm [shape: f32[1,128], index: 4, kind: output, shape index: {}]  }
   0x1   :  { %10 = vsyncpa [#allocation4], 0  ;;  %s15_s17 = sshll.u32 %s781_s0, 4  ;;  %s561_s18 = smov [#allocation2]   ;;  %s16_s17 = int_to_ptr.hbm [resolvable:$true] %s15_s17 }
   0x2   :  { %s17_s19 = sshll.u32 %s561_s18, 4  ;;  %s562_s20 = smov 128   ;;  %s18_s19 = int_to_ptr.vmem [resolvable:$true] %s17_s19 }
   0x3   :  { %s563_s21 = smov 8  }
   0x4   :  { %23 = dma.hbm_to_vmem [thread:$0]  %s16_s17, 2048, %s18_s19, [#allocation3], %s562_s20, %s562_s20, %s563_s21  }
   0x5   :  { %557 = dma.done.wait [#allocation3], 2048  }
   0x6   :  { %558 = vsyncadd [#allocation3], 4294965248  ;;  %v564_v0 = vmov 0   ;;  %v57_v1 = vld [vmem:[#allocation2 + $0x78] sm:$0xff]  ;;  %v56_v2 = vld [vmem:[#allocation2 + $0x70] sm:$0xff]  ;;  %v565_v33 = vmov 1  }
   0x7   :  { %470 = vset.pattern.permute.xlu0 %v564_v0  ;;  %471 = vset.pattern.permute.xlu1 %v564_v0  ;;  %v55_v3 = vld [vmem:[#allocation2 + $0x68] sm:$0xff]  ;;  %v54_v4 = vld [vmem:[#allocation2 + $0x60] sm:$0xff]  ;;  %v53_v5 = vld [vmem:[#allocation2 + $0x58] sm:$0xff]  ;;  %s398_s5 = sshll.u32 %s785_s4, 4  ;;  %s399_s5 = int_to_ptr.hbm [resolvable:$true] %s398_s5 }
   0x8   :  { %472 = vset.pattern.permute.xlu2 %v564_v0  ;;  %58 = vmatpush.msra.mxu0 %v57_v1  ;;  %v52_v6 = vld [vmem:[#allocation2 + $0x50] sm:$0xff]  ;;  %v51_v7 = vld [vmem:[#allocation2 + $0x48] sm:$0xff]  ;;  %v50_v8 = vld [vmem:[#allocation2 + $0x40] sm:$0xff] }
   0x9   :  { %416 = vmatpush.msra.mxu1 %v57_v1  ;;  %417 = vmatpush.msra.mxu2 %v57_v1  ;;  %v49_v9 = vld [vmem:[#allocation2 + $0x38] sm:$0xff]  ;;  %v48_v10 = vld [vmem:[#allocation2 + $0x30] sm:$0xff]  ;;  %v47_v11 = vld [vmem:[#allocation2 + $0x28] sm:$0xff] }
   0xa   :  { %418 = vmatpush.msra.mxu3 %v57_v1  ;;  %59 = vmatpush.msra.mxu0 %v56_v2  ;;  %v46_v12 = vld [vmem:[#allocation2 + $0x20] sm:$0xff]  ;;  %v45_v13 = vld [vmem:[#allocation2 + $0x18] sm:$0xff]  ;;  %v44_v15 = vld [vmem:[#allocation2 + $0x10] sm:$0xff] }
   0xb   :  { %419 = vmatpush.msra.mxu1 %v56_v2  ;;  %420 = vmatpush.msra.mxu2 %v56_v2  ;;  %v99_v14 = vld [vmem:[%s783_s2] sm:$0xff]  ;;  %v43_v16 = vld [vmem:[#allocation2 + $0x8] sm:$0xff]  ;;  %v101_v17 = vld [vmem:[%s783_s2 + $0x10] sm:$0xff] }
   0xc   :  { %421 = vmatpush.msra.mxu3 %v56_v2  ;;  %60 = vmatpush.msra.mxu0 %v55_v3  ;;  %v42_v18 = vld [vmem:[#allocation2] sm:$0xff]  ;;  %v36_v20 = vld [vmem:[%s782_s1 + $0x10] sm:$0xff]  ;;  %v100_v23 = vld [vmem:[%s783_s2 + $0x8] sm:$0xff] }
   0xd   :  { %422 = vmatpush.msra.mxu1 %v55_v3  ;;  %423 = vmatpush.msra.mxu2 %v55_v3  ;;  %v34_v19 = vld [vmem:[%s782_s1] sm:$0xff]  ;;  %v40_v22 = vld [vmem:[%s782_s1 + $0x30] sm:$0xff]  ;;  %v102_v25 = vld [vmem:[%s783_s2 + $0x18] sm:$0xff] }
   0xe   :  { %424 = vmatpush.msra.mxu3 %v55_v3  ;;  %61 = vmatpush.msra.mxu0 %v54_v4  ;;  %v38_v21 = vld [vmem:[%s782_s1 + $0x20] sm:$0xff]  ;;  %v35_v26 = vld [vmem:[%s782_s1 + $0x8] sm:$0xff]  ;;  %v37_v27 = vld [vmem:[%s782_s1 + $0x18] sm:$0xff] }
   0xf   :  { %425 = vmatpush.msra.mxu1 %v54_v4  ;;  %426 = vmatpush.msra.mxu2 %v54_v4  ;;  %v103_v24 = vld [vmem:[%s783_s2 + $0x20] sm:$0xff]  ;;  %v39_v28 = vld [vmem:[%s782_s1 + $0x28] sm:$0xff]  ;;  %v41_v29 = vld [vmem:[%s782_s1 + $0x38] sm:$0xff] }
  0x10   :  { %427 = vmatpush.msra.mxu3 %v54_v4  ;;  %62 = vmatpush.msra.mxu0 %v53_v5  ;;  %v105_v30 = vld [vmem:[%s783_s2 + $0x30] sm:$0xff]  ;;  %v104_v31 = vld [vmem:[%s783_s2 + $0x28] sm:$0xff]  ;;  %v106_v32 = vld [vmem:[%s783_s2 + $0x38] sm:$0xff] }
  0x11   :  { %428 = vmatpush.msra.mxu1 %v53_v5  ;;  %429 = vmatpush.msra.mxu2 %v53_v5  ;;  %v371_v34 = vld [vmem:[%s784_s3] sm:$0x1] }
  0x12   :  { %430 = vmatpush.msra.mxu3 %v53_v5  ;;  %63 = vmatpush.msra.mxu0 %v52_v6  ;;  %v370_v35 = vld [vmem:[%s784_s3] sm:$0xff]  ;;  %s566_s3 = smov [#allocation5]  }
  0x13   :  { %431 = vmatpush.msra.mxu1 %v52_v6  ;;  %432 = vmatpush.msra.mxu2 %v52_v6  ;;  %s396_s28 = sshll.u32 %s566_s3, 4  ;;  %s397_s28 = int_to_ptr.vmem [resolvable:$true] %s396_s28 }
  0x14   :  { %433 = vmatpush.msra.mxu3 %v52_v6  ;;  %64 = vmatpush.msra.mxu0 %v51_v7 }
  0x15   :  { %434 = vmatpush.msra.mxu1 %v51_v7  ;;  %435 = vmatpush.msra.mxu2 %v51_v7 }
  0x16   :  { %436 = vmatpush.msra.mxu3 %v51_v7  ;;  %65 = vmatpush.msra.mxu0 %v50_v8 }
  0x17   :  { %437 = vmatpush.msra.mxu1 %v50_v8  ;;  %438 = vmatpush.msra.mxu2 %v50_v8 }
  0x18   :  { %439 = vmatpush.msra.mxu3 %v50_v8  ;;  %66 = vmatpush.msra.mxu0 %v49_v9 }
  0x19   :  { %440 = vmatpush.msra.mxu1 %v49_v9  ;;  %441 = vmatpush.msra.mxu2 %v49_v9 }
  0x1a   :  { %442 = vmatpush.msra.mxu3 %v49_v9  ;;  %67 = vmatpush.msra.mxu0 %v48_v10 }
  0x1b   :  { %443 = vmatpush.msra.mxu1 %v48_v10  ;;  %444 = vmatpush.msra.mxu2 %v48_v10 }
  0x1c   :  { %445 = vmatpush.msra.mxu3 %v48_v10  ;;  %68 = vmatpush.msra.mxu0 %v47_v11 }
  0x1d   :  { %446 = vmatpush.msra.mxu1 %v47_v11  ;;  %447 = vmatpush.msra.mxu2 %v47_v11 }
  0x1e   :  { %448 = vmatpush.msra.mxu3 %v47_v11  ;;  %69 = vmatpush.msra.mxu0 %v46_v12 }
  0x1f   :  { %449 = vmatpush.msra.mxu1 %v46_v12  ;;  %450 = vmatpush.msra.mxu2 %v46_v12 }
  0x20   :  { %451 = vmatpush.msra.mxu3 %v46_v12  ;;  %70 = vmatpush.msra.mxu0 %v45_v13 }
  0x21   :  { %452 = vmatpush.msra.mxu1 %v45_v13  ;;  %453 = vmatpush.msra.mxu2 %v45_v13 }
  0x22   :  { %454 = vmatpush.msra.mxu3 %v45_v13  ;;  %109 = vperm.xlu0 %470, %v99_v14  }
  0x23   :  { %71 = vmatpush.msra.mxu0 %v44_v15  ;;  %455 = vmatpush.msra.mxu1 %v44_v15 }
  0x24   :  { %456 = vmatpush.msra.mxu2 %v44_v15  ;;  %457 = vmatpush.msra.mxu3 %v44_v15 }
  0x25   :  { %72 = vmatpush.msra.mxu0 %v43_v16  ;;  %458 = vmatpush.msra.mxu1 %v43_v16 }
  0x26   :  { %459 = vmatpush.msra.mxu2 %v43_v16  ;;  %460 = vmatpush.msra.mxu3 %v43_v16 }
  0x27   :  { %174 = vperm.xlu1 %471, %v101_v17   ;;  %73 = vmatpush.msra.mxu0 %v42_v18 }
  0x28   :  { %461 = vmatpush.msra.mxu1 %v42_v18  ;;  %462 = vmatpush.msra.mxu2 %v42_v18 }
  0x29   :  { %463 = vmatpush.msra.mxu3 %v42_v18  ;;  %74 = vmatmul.f32.vlgmr.msra.gmra.mxu0 %v34_v19 }
  0x2a   :  { %80 = vmatmul.f32.vlgmr.msra.gmra.mxu1 %v36_v20  ;;  %86 = vmatmul.f32.vlgmr.msra.gmra.mxu2 %v38_v21 }
  0x2b   :  { %92 = vmatmul.f32.vlgmr.msra.gmra.mxu3 %v40_v22  ;;  %141 = vperm.xlu0 %470, %v100_v23  }
  0x2c   :  { %240 = vperm.xlu2 %472, %v103_v24  }
  0x2f   :  { %207 = vperm.xlu1 %471, %v102_v25  }
  0x31   :  { %77 = vmatmul.f32.gmra.mxu0 %v35_v26 }
  0x32   :  { %83 = vmatmul.f32.gmra.mxu1 %v37_v27  ;;  %89 = vmatmul.f32.gmra.mxu2 %v39_v28 }
  0x33   :  { %95 = vmatmul.f32.gmra.mxu3 %v41_v29  ;;  %306 = vperm.xlu0 %470, %v105_v30  }
  0x34   :  { %273 = vperm.xlu2 %472, %v104_v31  }
  0x37   :  { %339 = vperm.xlu1 %471, %v106_v32  }
  0x3b   :  { %474 = vset.pattern.permute.xlu0 %v565_v33 }
  0x3c   :  { %473 = vset.pattern.permute.xlu2 %v565_v33  ;;  %166 = vperm.xlu0 %474, %v100_v23  }
  0x3d   :  { %134 = vperm.xlu2 %473, %v99_v14  }
  0x3f   :  { %475 = vset.pattern.permute.xlu1 %v565_v33 }
  0x40   :  { %199 = vperm.xlu1 %475, %v101_v17  }
  0x44   :  { %331 = vperm.xlu0 %474, %v105_v30  }
  0x45   :  { %232 = vperm.xlu2 %473, %v102_v25  }
  0x48   :  { %265 = vperm.xlu1 %475, %v103_v24  }
  0x4c   :  { %386 = vperm.xlu0 %474, %v371_v34  }
  0x4d   :  { %298 = vperm.xlu2 %473, %v104_v31  }
  0x50   :  { %364 = vperm.xlu1 %475, %v106_v32  }
  0x55   :  { %476 = vset.pattern.permute.xlu2 %v564_v0 }
  0x56   :  { %374 = vperm.xlu2 %476, %v370_v35  }
  0x86   :  { %v241_v46 = vpop.permute.xlu2 %240 }
  0x8e   :  { %v274_v1 = vpop.permute.xlu2 %273 }
  0x94   :  { %v110_v36 = vpop.permute.xlu0 %109 }
  0x99   :  { %v175_v37 = vpop.permute.xlu1 %174 }
  0x9d   :  { %v142_v38 = vpop.permute.xlu0 %141 }
  0xa1   :  { %v208_v45 = vpop.permute.xlu1 %207 }
  0xa5   :  { %v307_v47 = vpop.permute.xlu0 %306 }
  0xa6   :  { %v75_v39 = vpop.f32.mrf.mxu0 }
  0xa7   :  { %v81_v40 = vpop.f32.mrf.mxu1  ;;  %v112_v41 = vsub.f32 %v75_v39, %v110_v36 }
  0xa8   :  { %v177_v42 = vsub.f32 %v81_v40, %v175_v37 }
  0xa9   :  { %v408_v43 = vmul.f32 -1.442695, %v112_v41  ;;  %v340_v0 = vpop.permute.xlu1 %339 }
  0xaa   :  { %v410_v44 = vmul.f32 -1.442695, %v177_v42  ;;  %v135_v42 = vpop.permute.xlu2 %134 }
  0xab   :  { %477 = vpow2.f32 %v408_v43 }
  0xac   :  { %479 = vpow2.f32 %v410_v44 }
  0xad   :  { %v87_v48 = vpop.f32.mrf.mxu2 }
  0xae   :  { %v93_v49 = vpop.f32.mrf.mxu3  ;;  %v243_v50 = vsub.f32 %v87_v48, %v241_v46  ;;  %v78_v52 = vpop.f32.mrf.mxu0 }
  0xaf   :  { %v309_v51 = vsub.f32 %v93_v49, %v307_v47  ;;  %v84_v53 = vpop.f32.mrf.mxu1  ;;  %v144_v54 = vsub.f32 %v78_v52, %v142_v38 }
  0xb0   :  { %v210_v55 = vsub.f32 %v84_v53, %v208_v45  ;;  %v412_v56 = vmul.f32 -1.442695, %v243_v50 }
  0xb1   :  { %v414_v57 = vmul.f32 -1.442695, %v309_v51  ;;  %v478_v58 = vpop.eup %477  ;;  %v409_v61 = vmul.f32 -1.442695, %v144_v54 }
  0xb2   :  { %v480_v59 = vpop.eup %479  ;;  %v116_v60 = vadd.f32 1.0, %v478_v58  ;;  %481 = vpow2.f32 %v412_v56  ;;  %v411_v63 = vmul.f32 -1.442695, %v210_v55 }
  0xb3   :  { %v653_v62 = vadd.f32 1.0, %v480_v59  ;;  %483 = vpow2.f32 %v414_v57 }
  0xb4   :  { %485 = vrcp.f32 %v116_v60  ;;  %v126_v8 = vand.u32 2147483647, %v116_v60  ;;  %v128_v13 = vand.u32 2147483648, %v116_v60  ;;  %vm122_vm0 = vweird.f32 %v116_v60 }
  0xb5   :  { %487 = vrcp.f32 %v653_v62  ;;  %v90_v2 = vpop.f32.mrf.mxu2  ;;  %v191_v14 = vand.u32 2147483647, %v653_v62  ;;  %v193_v17 = vand.u32 2147483648, %v653_v62  ;;  %vm187_vm2 = vweird.f32 %v653_v62 }
  0xb6   :  { %v96_v3 = vpop.f32.mrf.mxu3  ;;  %489 = vpow2.f32 %v409_v61  ;;  %v276_v4 = vsub.f32 %v90_v2, %v274_v1  ;;  %vm661_vm1 = vcmp.eq.f32.partialorder %v126_v8, 8.507059e+37  ;;  %v129_v26 = vor.u32 1.1754944e-38, %v128_v13  ;;  %v200_v1 = vpop.permute.xlu1 %199 }
  0xb7   :  { %v342_v5 = vsub.f32 %v96_v3, %v340_v0  ;;  %491 = vpow2.f32 %v411_v63  ;;  %vm673_vm3 = vcmp.eq.f32.partialorder %v191_v14, 8.507059e+37  ;;  %v194_v30 = vor.u32 1.1754944e-38, %v193_v17 }
  0xb8   :  { %v482_v6 = vpop.eup %481  ;;  %v413_v7 = vmul.f32 -1.442695, %v276_v4 }
  0xb9   :  { %v484_v9 = vpop.eup %483  ;;  %v656_v10 = vadd.f32 1.0, %v482_v6  ;;  %v415_v11 = vmul.f32 -1.442695, %v342_v5 }
  0xba   :  { %v486_v12 = vpop.eup %485  ;;  %493 = vpow2.f32 %v413_v7  ;;  %v667_v22 = vadd.f32 1.0, %v484_v9 }
  0xbb   :  { %v488_v15 = vpop.eup %487  ;;  %495 = vrcp.f32 %v656_v10  ;;  %v118_v16 = vmul.f32 %v486_v12, %v116_v60  ;;  %vm123_vm4 = vweird.f32 %v486_v12  ;;  %v257_v33 = vand.u32 2147483647, %v656_v10 }
  0xbc   :  { %v490_v18 = vpop.eup %489  ;;  %v183_v20 = vmul.f32 %v488_v15, %v653_v62  ;;  %497 = vpow2.f32 %v415_v11  ;;  %vm188_vm5 = vweird.f32 %v488_v15  ;;  %vm253_vm6 = vweird.f32 %v656_v10  ;;  %vm124_vm7 = vmor %vm122_vm0, %vm123_vm4 }
  0xbd   :  { %v492_v21 = vpop.eup %491  ;;  %v669_v23 = vadd.f32 1.0, %v490_v18  ;;  %v119_v24 = vsub.f32 1.0, %v118_v16  ;;  %vm189_vm8 = vmor %vm187_vm2, %vm188_vm5  ;;  %v259_v45 = vand.u32 2147483648, %v656_v10  ;;  %vm703_vm10 = vcmp.eq.f32.partialorder %v257_v33, 8.507059e+37 }
  0xbe   :  { %v671_v25 = vadd.f32 1.0, %v492_v21  ;;  %v184_v27 = vsub.f32 1.0, %v183_v20  ;;  %vm319_vm2 = vweird.f32 %v667_v22  ;;  %v325_v33 = vand.u32 2147483648, %v667_v22 }
  0xbf   :  { %499 = vrcp.f32 %v669_v23  ;;  %v120_v29 = vmul.f32 %v486_v12, %v119_v24  ;;  %v158_v39 = vand.u32 2147483647, %v669_v23  ;;  %vm154_vm9 = vweird.f32 %v669_v23 }
  0xc0   :  { %v494_v31 = vpop.eup %493  ;;  %501 = vrcp.f32 %v671_v25  ;;  %v185_v32 = vmul.f32 %v488_v15, %v184_v27  ;;  %v226_v38 = vand.u32 2147483648, %v671_v25  ;;  %v224_v44 = vand.u32 2147483647, %v671_v25 }
  0xc1   :  { %v680_v34 = vpop.eup %495  ;;  %503 = vrcp.f32 %v667_v22  ;;  %v683_v35 = vadd.f32 1.0, %v494_v31  ;;  %v121_v36 = vadd.f32 %v486_v12, %v120_v29  ;;  %v160_v49 = vand.u32 2147483648, %v669_v23  ;;  %v167_v31 = vpop.permute.xlu0 %166 }
  0xc2   :  { %v186_v37 = vadd.f32 %v488_v15, %v185_v32  ;;  %v249_v40 = vmul.f32 %v680_v34, %v656_v10  ;;  %v498_v41 = vpop.eup %497  ;;  %vm220_vm11 = vweird.f32 %v671_v25  ;;  %v227_v57 = vor.u32 1.1754944e-38, %v226_v38  ;;  %v233_v10 = vpop.permute.xlu2 %232 }
  0xc3   :  { %505 = vrcp.f32 %v683_v35  ;;  %v125_v43 = vsel %vm124_vm7, %v486_v12, %v121_v36  ;;  %v697_v46 = vadd.f32 1.0, %v498_v41  ;;  %vm711_vm12 = vcmp.eq.f32.partialorder %v158_v39, 8.507059e+37 }
  0xc4   :  { %v130_v47 = vsel %vm661_vm1, %v129_v26, %v125_v43  ;;  %v190_v48 = vsel %vm189_vm8, %v488_v15, %v186_v37  ;;  %v250_v54 = vsub.f32 1.0, %v249_v40  ;;  %vm720_vm13 = vcmp.eq.f32.partialorder %v224_v44, 8.507059e+37  ;;  %v266_v43 = vpop.permute.xlu1 %265 }
  0xc5   :  { %v500_v51 = vpop.eup %499  ;;  %v132_v52 = vsub.f32 1.0, %v130_v47  ;;  %v195_v53 = vsel %vm673_vm3, %v194_v30, %v190_v48  ;;  %vm254_vm14 = vweird.f32 %v680_v34  ;;  %507 = vrcp.f32 %v697_v46 }
  0xc6   :  { %v502_v55 = vpop.eup %501  ;;  %v197_v56 = vsub.f32 1.0, %v195_v53  ;;  %v150_v58 = vmul.f32 %v500_v51, %v669_v23  ;;  %v251_v0 = vmul.f32 %v680_v34, %v250_v54  ;;  %v161_v3 = vor.u32 1.1754944e-38, %v160_v49  ;;  %vm255_vm1 = vmor %vm253_vm6, %vm254_vm14 }
  0xc7   :  { %v715_v60 = vpop.eup %503  ;;  %v717_v61 = vmul.f32 %v135_v42, %v132_v52  ;;  %v216_v62 = vmul.f32 %v502_v55, %v671_v25  ;;  %v260_v4 = vor.u32 1.1754944e-38, %v259_v45  ;;  %vm155_vm15 = vweird.f32 %v500_v51 }
  0xc8   :  { %v151_v2 = vsub.f32 1.0, %v150_v58  ;;  %v252_v7 = vadd.f32 %v680_v34, %v251_v0  ;;  %v290_v8 = vand.u32 2147483647, %v683_v35  ;;  %v729_v9 = vmul.f32 %v200_v1, %v197_v56  ;;  %vm156_vm4 = vmor %vm154_vm9, %vm155_vm15 }
  0xc9   :  { %v506_v5 = vpop.eup %505  ;;  %v217_v6 = vsub.f32 1.0, %v216_v62  ;;  %vm221_vm0 = vweird.f32 %v502_v55  ;;  %v138_v13 = vsub.f32 1.0, %v717_v61  ;;  %vm286_vm3 = vweird.f32 %v683_v35 }
  0xca   :  { %v152_v11 = vmul.f32 %v500_v51, %v151_v2  ;;  %v282_v12 = vmul.f32 %v506_v5, %v683_v35  ;;  %v256_v15 = vsel %vm255_vm1, %v680_v34, %v252_v7  ;;  %v292_v18 = vand.u32 2147483648, %v683_v35  ;;  %vm222_vm7 = vmor %vm220_vm11, %vm221_vm0  ;;  %v332_v2 = vpop.permute.xlu0 %331 }
  0xcb   :  { %v218_v14 = vmul.f32 %v502_v55, %v217_v6  ;;  %v315_v19 = vmul.f32 %v715_v60, %v667_v22  ;;  %v261_v21 = vsel %vm703_vm10, %v260_v4, %v256_v15  ;;  %vm287_vm5 = vweird.f32 %v506_v5  ;;  %v508_v26 = vpop.eup %507 }
  0xcc   :  { %v153_v16 = vadd.f32 %v500_v51, %v152_v11  ;;  %v283_v17 = vsub.f32 1.0, %v282_v12  ;;  %vm746_vm6 = vcmp.eq.f32.partialorder %v290_v8, 8.507059e+37  ;;  %v323_v30 = vand.u32 2147483647, %v667_v22  ;;  %vm288_vm9 = vmor %vm286_vm3, %vm287_vm5  ;;  %v299_v22 = vpop.permute.xlu2 %298  ;;  %v365_v12 = vpop.permute.xlu1 %364 }
  0xcd   :  { %v219_v20 = vadd.f32 %v502_v55, %v218_v14  ;;  %v316_v29 = vsub.f32 1.0, %v315_v19  ;;  %vm320_vm8 = vweird.f32 %v715_v60  ;;  %v263_v39 = vsub.f32 1.0, %v261_v21 }
  0xce   :  { %v157_v27 = vsel %vm156_vm4, %v500_v51, %v153_v16  ;;  %v284_v28 = vmul.f32 %v506_v5, %v283_v17  ;;  %v293_v40 = vor.u32 1.1754944e-38, %v292_v18  ;;  %v348_v41 = vmul.f32 %v508_v26, %v697_v46  ;;  %vm321_vm11 = vmor %vm319_vm2, %vm320_vm8 }
  0xcf   :  { %v223_v23 = vsel %vm222_vm7, %v502_v55, %v219_v20  ;;  %v162_v32 = vsel %vm711_vm12, %v161_v3, %v157_v27  ;;  %v317_v37 = vmul.f32 %v715_v60, %v316_v29  ;;  %vm324_vm10 = vcmp.eq.f32.partialorder %v323_v30, 8.507059e+37 }
  0xd0   :  { %v228_v34 = vsel %vm720_vm13, %v227_v57, %v223_v23  ;;  %v164_v36 = vsub.f32 1.0, %v162_v32  ;;  %v285_v25 = vadd.f32 %v506_v5, %v284_v28  ;;  %v326_v35 = vor.u32 1.1754944e-38, %v325_v33 }
  0xd1   :  { %v230_v38 = vsub.f32 1.0, %v228_v34  ;;  %v318_v45 = vadd.f32 %v715_v60, %v317_v37  ;;  %v349_v49 = vsub.f32 1.0, %v348_v41  ;;  %vm353_vm12 = vweird.f32 %v508_v26 }
  0xd2   :  { %v169_v42 = vmul.f32 %v167_v31, %v164_v36  ;;  %v289_v44 = vsel %vm288_vm9, %v506_v5, %v285_v25  ;;  %v356_v55 = vand.u32 2147483647, %v697_v46  ;;  %v358_v56 = vand.u32 2147483648, %v697_v46  ;;  %v387_v28 = vpop.permute.xlu0 %386 }
  0xd3   :  { %v235_v47 = vmul.f32 %v233_v10, %v230_v38  ;;  %v294_v48 = vsel %vm746_vm6, %v293_v40, %v289_v44  ;;  %v322_v52 = vsel %vm321_vm11, %v715_v60, %v318_v45  ;;  %v350_v54 = vmul.f32 %v508_v26, %v349_v49 }
  0xd4   :  { %v170_v50 = vsub.f32 1.0, %v169_v42  ;;  %v296_v51 = vsub.f32 1.0, %v294_v48  ;;  %v327_v53 = vsel %vm324_vm10, %v326_v35, %v322_v52  ;;  %v203_v57 = vsub.f32 1.0, %v729_v9  ;;  %v375_v17 = vpop.permute.xlu2 %374 }
  0xd5   :  { %v268_v59 = vmul.f32 %v266_v43, %v263_v39  ;;  %v329_v61 = vsub.f32 1.0, %v327_v53  ;;  %v351_v62 = vadd.f32 %v508_v26, %v350_v54  ;;  %vm352_vm13 = vweird.f32 %v697_v46 }
  0xd6   :  { %v171_v58 = vmul.f32 %v170_v50, %v138_v13  ;;  %v236_v63 = vsub.f32 1.0, %v235_v47  ;;  %v301_v1 = vmul.f32 %v299_v22, %v296_v51  ;;  %vm354_vm14 = vmor %vm352_vm13, %vm353_vm12  ;;  %v359_v60 = vor.u32 1.1754944e-38, %v358_v56 }
  0xd7   :  { %v355_v3 = vsel %vm354_vm14, %v508_v26, %v351_v62  ;;  %vm357_vm15 = vcmp.eq.f32.partialorder %v356_v55, 8.507059e+37  ;;  %v269_v5 = vsub.f32 1.0, %v268_v59  ;;  %v334_v6 = vmul.f32 %v332_v2, %v329_v61 }
  0xd8   :  { %v204_v0 = vmul.f32 %v203_v57, %v171_v58  ;;  %v360_v7 = vsel %vm357_vm15, %v359_v60, %v355_v3  ;;  %v302_v11 = vsub.f32 1.0, %v301_v1 }
  0xd9   :  { %v362_v8 = vsub.f32 1.0, %v360_v7  ;;  %v335_v46 = vsub.f32 1.0, %v334_v6 }
  0xda   :  { %v237_v4 = vmul.f32 %v236_v63, %v204_v0 }
  0xdb   :  { %v367_v13 = vmul.f32 %v365_v12, %v362_v8 }
  0xdc   :  { %v270_v9 = vmul.f32 %v269_v5, %v237_v4 }
  0xdd   :  { %v368_v16 = vsub.f32 1.0, %v367_v13 }
  0xde   :  { %v303_v14 = vmul.f32 %v302_v11, %v270_v9 }
  0xe0   :  { %v336_v15 = vmul.f32 %v335_v46, %v303_v14 }
  0xe2   :  { %v369_v18 = vmul.f32 %v368_v16, %v336_v15 }
  0xe4   :  { %v377_v19 = vmul.f32 %v375_v17, %v369_v18 }
  0xe6   :  { %v378_v10 = vrot.slane %v377_v19, 4 }
  0xe8   :  { %v379_v20 = vadd.f32 %v378_v10, %v377_v19 }
  0xea   :  { %v380_v21 = vrot.slane %v379_v20, 2 }
  0xec   :  { %v381_v24 = vadd.f32 %v380_v21, %v379_v20 }
  0xee   :  { %v382_v26 = vrot.slane %v381_v24, 1 }
  0xf0   :  { %v383_v27 = vadd.f32 %v382_v26, %v381_v24 }
  0xf2   :  { %v389_v29 = vadd.f32 %v387_v28, %v383_v27 }
  0xf4   :  { %390 = vst [vmem:[#allocation5] sm:$0x1] %v389_v29 }
  0xf5   :  { %401 = dma.vmem_to_hbm [thread:$0]  %s397_s28, 16, %s399_s5, [#allocation4]  }
  0xf6   :  { %559 = dma.done.wait [#allocation4], 16  }
  0xf7   :  { %560 = vsyncadd [#allocation4], 4294967280 }
  0xf8   :  { %406 = vsyncpa [#allocation3], 1 }
  0xf9   :  { %407 = vsyncpa [#allocation4], 1 }

</bundles_post_ra>
